<compile_context>
chip_gen: v7x
topology: tpu7x:2x2x1
jax: 0.10.0
libtpu: 0.0.40
codegen_flags: <defaults>
</compile_context>

<pallas_src>
import functools

import jax
import jax.numpy as jnp
from jax.experimental import pallas as pl
from jax.experimental.pallas import tpu as pltpu


def _cdiv(a, b):
    return -(-a // b)


def _round_up(x, m):
    return _cdiv(x, m) * m


def _plan(B, T, D, x_itemsize, w_itemsize, max_tt=None):
    """Pick batch/time tiles and a VMEM limit.

    * >=2 batch blocks when B >= 2 (v7x megacore: both TCs get work on the
      "parallel" axis); at most 8 rows per block.
    * Time tile sized from the local TPU generation's VMEM capacity,
      accounting for in-kernel temporaries on top of the double-buffered x
      block and the single-buffered bf16 W^T.
    * Balanced time tiles to minimize last-tile padding.
    """
    # ---- batch blocking --------------------------------------------------
    if B <= 1:
        Bb = 1
    else:
        n_bblk = max(2, _cdiv(B, 8))           # <= 8 rows/block, >= 2 blocks
        Bb = _cdiv(B, n_bblk)
    n_bblk = _cdiv(B, Bb)

    # ---- VMEM budget -----------------------------------------------------
    try:
        vmem_cap = int(pltpu.get_tpu_info().vmem_capacity_bytes)
    except Exception:                           # pragma: no cover
        vmem_cap = 64 << 20                     # conservative: v7x per-core VMEM
    budget = vmem_cap // 3                      # whole-kernel target incl. temps

    # Bytes per x-tile element: 2x input (double-buffered DMA) + bf16 matmul
    # cast + ~4 f32 tile-sized temporaries (masked x, h, xw, x*xw).
    per_elem = 2 * x_itemsize + 2 + 4 * 4
    fixed = D * D * w_itemsize + 4 * Bb * D * 4 + (4 << 20)
    tt_max = (budget - fixed) // max(1, Bb * D * per_elem)
    tt_max = max(8, min(int(tt_max), 2048))
    tt_max = (tt_max // 8) * 8
    if max_tt is not None:
        tt_max = max(8, min(tt_max, (int(max_tt) // 8) * 8))

    # ---- balanced time tiles ----------------------------------------------
    n_ttiles = _cdiv(T, min(tt_max, _round_up(T, 8)))
    Tt = _round_up(_cdiv(T, n_ttiles), 8)
    n_ttiles = _cdiv(T, Tt)

    # ---- compiler VMEM limit (accounts for the same temporaries) ----------
    est = (2 * Bb * Tt * D * x_itemsize         # double-buffered x block
           + Bb * Tt * D * (4 * 4 + 2)          # in-kernel temporaries
           + D * D * w_itemsize                 # single-buffered W^T
           + 2 * Bb * 2 * D * 4                 # double-buffered output block
           + 2 * Bb * D * 4 + 4 * Bb * 4        # scratch accumulators
           + (6 << 20))                         # headroom
    vmem_limit = int(min(max(est, 32 << 20),
                         max(vmem_cap - (4 << 20), 32 << 20)))
    return Bb, n_bblk, Tt, n_ttiles, vmem_limit


def _asp_kernel(ntiles_ref, lens_ref, x_ref, wt_ref, bias_ref, att_ref, o_ref,
                m_sc, l_sc, s1_sc, s2_sc):
    b_step = pl.program_id(0)
    t_step = pl.program_id(1)
    Bb, Tt, D = x_ref.shape

    @pl.when(t_step == 0)
    def _():
        m_sc[...] = jnp.full(m_sc.shape, -1e30, m_sc.dtype)
        l_sc[...] = jnp.zeros_like(l_sc)
        s1_sc[...] = jnp.zeros_like(s1_sc)
        s2_sc[...] = jnp.zeros_like(s2_sc)

    # Ragged-length tile skipping: past the longest utterance in this batch
    # block the x BlockSpec index is clamped (DMA elided) and compute skipped.
    @pl.when(t_step < ntiles_ref[b_step])
    def _():
        lens = lens_ref[0]                                          # (Bb, 1) i32
        t0 = t_step * Tt
        # Build the validity mask directly in both layouts it is consumed in
        # (no bool-tile transpose).
        valid_l = (t0 + jax.lax.broadcasted_iota(jnp.int32, (Bb, Tt), 1)) < lens
        valid_s = (t0 + jax.lax.broadcasted_iota(jnp.int32, (Bb, Tt, 1), 1)
                   ) < lens[:, :, None]

        # Zero padded frames in x itself (NaN/Inf-safe; also neutralizes grid
        # tail blocks that map outside the real (B, T) extent).
        x = jnp.where(valid_s, x_ref[...], 0).astype(jnp.float32)   # (Bb,Tt,D)

        # h = tanh(x @ W^T + b): MXU matmul in W^T's dtype, f32 accumulation.
        x2d = x.reshape(Bb * Tt, D)
        h = jnp.tanh(
            jnp.dot(x2d.astype(wt_ref.dtype), wt_ref[...],
                    preferred_element_type=jnp.float32) + bias_ref[...])

        # Attention scores: VPU multiply + cross-lane reduce (MXU stays free).
        s = jnp.sum((h * att_ref[...]).reshape(Bb, Tt, D), axis=-1)  # (Bb, Tt)
        s = jnp.where(valid_l, s, -1e30)

        # Online softmax with unnormalized streaming statistics.
        m_prev = m_sc[...]                                           # (Bb, 1)
        m_new = jnp.maximum(m_prev, jnp.max(s, axis=-1, keepdims=True))
        alpha = jnp.exp(m_prev - m_new)
        e = jnp.where(valid_l, jnp.exp(s - m_new), 0.0)              # (Bb, Tt)

        xw = x * e[:, :, None]                                       # (Bb,Tt,D)
        l_sc[...] = alpha * l_sc[...] + jnp.sum(e, axis=-1, keepdims=True)
        s1_sc[...] = alpha * s1_sc[...] + jnp.sum(xw, axis=1)        # sum e*x
        s2_sc[...] = alpha * s2_sc[...] + jnp.sum(x * xw, axis=1)    # sum e*x^2
        m_sc[...] = m_new

    @pl.when(t_step == pl.num_programs(1) - 1)
    def _():
        # Deferred normalization; clamp guards feat_len == 0 / padded rows.
        inv_l = pl.reciprocal(jnp.maximum(l_sc[...], 1e-30), approx=False)
        mu = s1_sc[...] * inv_l                                      # (Bb, D)
        ex2 = s2_sc[...] * inv_l
        rh = jnp.sqrt(jnp.maximum(ex2 - mu * mu, 1e-5))
        o_ref[:, 0, :] = mu.astype(o_ref.dtype)
        o_ref[:, 1, :] = rh.astype(o_ref.dtype)


@functools.partial(jax.jit, static_argnames=("mxu_dtype", "max_tt"))
def attentive_stats_pooling(xs, feat_lens, w, bias, attention, *,
                            mxu_dtype=jnp.bfloat16, max_tt=None):
    """xs: (B, T, D), feat_lens: (B,) int, w: (D, D) nn.Linear weight
    (out, in), bias: (D,), attention: (D, 1).  Returns (B, 2*D) = [mu, std]."""
    B, T, D = xs.shape
    x_itemsize = jnp.dtype(xs.dtype).itemsize
    w_itemsize = jnp.dtype(mxu_dtype).itemsize
    Bb, n_bblk, Tt, n_ttiles, vmem_limit = _plan(
        B, T, D, x_itemsize, w_itemsize, max_tt)
    Bp = n_bblk * Bb

    # Only tiny per-row metadata is copied / padded; xs stays untouched in HBM.
    lens = jnp.minimum(jnp.asarray(feat_lens, jnp.int32).reshape(B), T)
    lens_p = jnp.pad(lens, (0, Bp - B)).reshape(n_bblk, Bb, 1)
    # Valid time tiles per batch block (scalar-prefetched; drives DMA elision
    # via a clamped index_map and compute skipping via pl.when).
    max_len = jnp.max(lens_p[..., 0], axis=1)                        # (n_bblk,)
    ntiles = jnp.clip((max_len + Tt - 1) // Tt, 1, n_ttiles).astype(jnp.int32)

    wt = jnp.asarray(w, jnp.float32).T.astype(mxu_dtype)             # (D, D)
    b2 = jnp.asarray(bias, jnp.float32).reshape(1, D)
    a2 = jnp.asarray(attention, jnp.float32).reshape(1, D)

    const = lambda b, t, nt: (0, 0)
    out3 = pl.pallas_call(
        _asp_kernel,
        out_shape=jax.ShapeDtypeStruct((Bp, 2, D), xs.dtype),
        grid_spec=pltpu.PrefetchScalarGridSpec(
            num_scalar_prefetch=1,
            grid=(n_bblk, n_ttiles),
            in_specs=[
                # feat_lens, (n_bblk, Bb, 1): index depends only on b -> the
                # tiny DMA is elided across the inner time loop.
                pl.BlockSpec((1, Bb, 1), lambda b, t, nt: (b, 0, 0)),
                # xs tile; time block index clamped to the last valid tile of
                # this batch block so fully-padded tiles re-use the same block
                # (DMA elided) and are skipped by pl.when in the kernel.
                pl.BlockSpec((Bb, Tt, D),
                             lambda b, t, nt: (b, jnp.minimum(t, nt[b] - 1), 0)),
                # Grid-invariant operands: single-buffered to save VMEM.
                pl.BlockSpec((D, D), const, pipeline_mode=pl.Buffered(1)),  # W^T
                pl.BlockSpec((1, D), const, pipeline_mode=pl.Buffered(1)),  # bias
                pl.BlockSpec((1, D), const, pipeline_mode=pl.Buffered(1)),  # att
            ],
            out_specs=pl.BlockSpec((Bb, 2, D), lambda b, t, nt: (b, 0, 0)),
            scratch_shapes=[
                pltpu.VMEM((Bb, 1), jnp.float32),    # running max  m
                pltpu.VMEM((Bb, 1), jnp.float32),    # running denom l
                pltpu.VMEM((Bb, D), jnp.float32),    # running sum e*x
                pltpu.VMEM((Bb, D), jnp.float32),    # running sum e*x^2
            ],
        ),
        compiler_params=pltpu.CompilerParams(
            dimension_semantics=("parallel", "arbitrary"),
            vmem_limit_bytes=vmem_limit,
        ),
    )(ntiles, lens_p, xs, wt, b2, a2)

    # (Bp, 2, D) -> (B, 2*D): drop batch padding; contiguous reshape (no pad
    # columns, so mu/std land exactly in [0, D) / [D, 2D)).
    return out3[:B].reshape(B, 2 * D)


def _reference(xs, feat_lens, w, bias, attention, mxu_dtype=jnp.float32):
    """Plain-JAX reference mimicking the PyTorch per-sample loop.  mxu_dtype
    lets us round matmul operands exactly like the kernel's MXU path."""
    hp = jax.lax.Precision.HIGHEST
    wt = jnp.asarray(w, jnp.float32).T
    wq = wt.astype(mxu_dtype).astype(jnp.float32)
    outs = []
    for x, L in zip(xs, feat_lens):
        xv = x[: int(L)].astype(jnp.float32)                         # (L, D)
        xq = xv.astype(mxu_dtype).astype(jnp.float32)
        h = jnp.tanh(jnp.dot(xq, wq, precision=hp) + bias)           # (L, D)
        s = jnp.dot(h, attention, precision=hp)[:, 0]                # (L,)
        wgt = jax.nn.softmax(s)[:, None]                             # (L, 1)
        mu = jnp.sum(xv * wgt, axis=0)
        rh = jnp.sqrt(jnp.maximum(jnp.sum(xv * xv * wgt, axis=0) - mu * mu, 1e-5))
        outs.append(jnp.concatenate([mu, rh]))
    return jnp.stack(outs)


if __name__ == "__main__":
    B, T, D = 2, 16, 32
    key = jax.random.PRNGKey(0)
    k_x, k_w, k_b, k_a = jax.random.split(key, 4)

    xs = jax.random.normal(k_x, (B, T, D), dtype=jnp.float32)
    feat_lens = jnp.array([16, 10], dtype=jnp.int32)

    # Deterministic parameter init (nn.Linear(D, D) weight/bias, attention (D,1)).
    bound = 1.0 / (D ** 0.5)
    w_linear = jax.random.uniform(k_w, (D, D), jnp.float32, -bound, bound)  # (out,in)
    bias = jax.random.uniform(k_b, (D,), jnp.float32, -bound, bound)
    attention = jax.random.normal(k_a, (D, 1), dtype=jnp.float32)            # std=1

    out = attentive_stats_pooling(xs, feat_lens, w_linear, bias, attention)
    out = jax.block_until_ready(out)
    assert out.shape == (B, 2 * D)

    # Tight check vs a reference whose matmul operands are bf16-rounded exactly
    # like the kernel's MXU path.
    ref_matched = _reference(xs, feat_lens, w_linear, bias, attention,
                             mxu_dtype=jnp.bfloat16)
    assert jnp.allclose(out, ref_matched, atol=1e-3, rtol=1e-3)

    # Loose check vs the full-f32 reference (only bf16 operand rounding differs).
    ref_f32 = _reference(xs, feat_lens, w_linear, bias, attention)
    assert jnp.allclose(out, ref_f32, atol=5e-2, rtol=5e-2)

    # Also exercise the streaming multi-tile + ragged-skip path with a forced
    # small time tile (2 time tiles; second row's last tile is fully padded).
    out_small = attentive_stats_pooling(xs, feat_lens, w_linear, bias,
                                        attention, max_tt=8)
    out_small = jax.block_until_ready(out_small)
    assert jnp.allclose(out_small, ref_matched, atol=1e-3, rtol=1e-3)

    print("KERNEL_OK")
</pallas_src>

<mosaic_0001>
module attributes {stable_mosaic.version = 11 : i64} {
  func.func @_asp_kernel(%arg0: i32, %arg1: i32, %arg2: memref<2xi32, #tpu.memory_space<smem>>, %arg3: memref<1x1x1xi32, #tpu.memory_space<vmem>>, %arg4: memref<1x16x32xf32, #tpu.memory_space<vmem>>, %arg5: memref<32x32xbf16, #tpu.memory_space<vmem>>, %arg6: memref<1x32xf32, #tpu.memory_space<vmem>>, %arg7: memref<1x32xf32, #tpu.memory_space<vmem>>, %arg8: memref<1x2x32xf32, #tpu.memory_space<vmem>>, %arg9: memref<1x1xf32, #tpu.memory_space<vmem>>, %arg10: memref<1x1xf32, #tpu.memory_space<vmem>>, %arg11: memref<1x32xf32, #tpu.memory_space<vmem>>, %arg12: memref<1x32xf32, #tpu.memory_space<vmem>>) attributes {dimension_semantics = [#tpu.dimension_semantics<parallel>, #tpu.dimension_semantics<arbitrary>], iteration_bounds = array<i64: 2, 1>, scalar_prefetch = 1 : i64, scratch_operands = 4 : i64, tpu.core_type = #tpu.core_type<tc>, window_params = [{transform_indices = @transform_0, window_bounds = array<i64: 1, 1, 1>}, {transform_indices = @transform_1, window_bounds = array<i64: 1, 16, 32>}, {pipeline_mode = #tpu.pipeline_mode<synchronous>, transform_indices = @transform_2, window_bounds = array<i64: 32, 32>}, {pipeline_mode = #tpu.pipeline_mode<synchronous>, transform_indices = @transform_3, window_bounds = array<i64: 1, 32>}, {pipeline_mode = #tpu.pipeline_mode<synchronous>, transform_indices = @transform_4, window_bounds = array<i64: 1, 32>}, {transform_indices = @transform_5, window_bounds = array<i64: 1, 2, 32>}]} {
    %c0_i32 = arith.constant 0 : i32
    %0 = arith.cmpi eq, %arg1, %c0_i32 : i32
    %1 = arith.extui %0 : i1 to i32
    %c0_i32_0 = arith.constant 0 : i32
    %2 = arith.cmpi ne, %1, %c0_i32_0 : i32
    scf.if %2 {
      %cst = arith.constant -1.000000e+30 : f32
      %11 = vector.broadcast %cst : f32 to vector<1x1xf32>
      %c0 = arith.constant 0 : index
      %c0_4 = arith.constant 0 : index
      %12 = vector.load %arg9[%c0, %c0_4] : memref<1x1xf32, #tpu.memory_space<vmem>>, vector<1x1xf32>
      tpu.vector_store %arg9[%c0, %c0_4], %11 {strides = array<i32>} : memref<1x1xf32, #tpu.memory_space<vmem>>, vector<1x1xf32>,
      %cst_5 = arith.constant 0.000000e+00 : f32
      %13 = vector.broadcast %cst_5 : f32 to vector<1x1xf32>
      %c0_6 = arith.constant 0 : index
      %c0_7 = arith.constant 0 : index
      %14 = vector.load %arg10[%c0_6, %c0_7] : memref<1x1xf32, #tpu.memory_space<vmem>>, vector<1x1xf32>
      tpu.vector_store %arg10[%c0_6, %c0_7], %13 {strides = array<i32>} : memref<1x1xf32, #tpu.memory_space<vmem>>, vector<1x1xf32>,
      %cst_8 = arith.constant 0.000000e+00 : f32
      %15 = vector.broadcast %cst_8 : f32 to vector<1x32xf32>
      %c0_9 = arith.constant 0 : index
      %c0_10 = arith.constant 0 : index
      %16 = vector.load %arg11[%c0_9, %c0_10] : memref<1x32xf32, #tpu.memory_space<vmem>>, vector<1x32xf32>
      tpu.vector_store %arg11[%c0_9, %c0_10], %15 {strides = array<i32>} : memref<1x32xf32, #tpu.memory_space<vmem>>, vector<1x32xf32>,
      %cst_11 = arith.constant 0.000000e+00 : f32
      %17 = vector.broadcast %cst_11 : f32 to vector<1x32xf32>
      %c0_12 = arith.constant 0 : index
      %c0_13 = arith.constant 0 : index
      %18 = vector.load %arg12[%c0_12, %c0_13] : memref<1x32xf32, #tpu.memory_space<vmem>>, vector<1x32xf32>
      tpu.vector_store %arg12[%c0_12, %c0_13], %17 {strides = array<i32>} : memref<1x32xf32, #tpu.memory_space<vmem>>, vector<1x32xf32>,
    } else {
    }
    %3 = arith.index_cast %arg0 : i32 to index
    %4 = memref.load %arg2[%3] : memref<2xi32, #tpu.memory_space<smem>>
    %5 = arith.cmpi slt, %arg1, %4 : i32
    %6 = arith.extui %5 : i1 to i32
    %c0_i32_1 = arith.constant 0 : i32
    %7 = arith.cmpi ne, %6, %c0_i32_1 : i32
    scf.if %7 {
      %c0 = arith.constant 0 : index
      %c0_4 = arith.constant 0 : index
      %c0_5 = arith.constant 0 : index
      %11 = vector.load %arg3[%c0, %c0_4, %c0_5] : memref<1x1x1xi32, #tpu.memory_space<vmem>>, vector<1x1x1xi32>
      %12 = vector.shape_cast %11 : vector<1x1x1xi32> to vector<1x1xi32>
      %c16_i32 = arith.constant 16 : i32
      %13 = arith.muli %arg1, %c16_i32 : i32
      %14 = tpu.iota {dimensions = array<i32: 1>} : vector<1x16xi32>
      %15 = vector.broadcast %13 : i32 to vector<1x16xi32>
      %16 = arith.addi %15, %14 : vector<1x16xi32>
      %17 = vector.broadcast %12 : vector<1x1xi32> to vector<1x16xi32>
      %18 = arith.cmpi slt, %16, %17 : vector<1x16xi32>
      %19 = tpu.iota {dimensions = array<i32: 1>} : vector<1x16x1xi32>
      %20 = vector.broadcast %13 : i32 to vector<1x16x1xi32>
      %21 = arith.addi %20, %19 : vector<1x16x1xi32>
      %22 = vector.shape_cast %12 : vector<1x1xi32> to vector<1x1x1xi32>
      %23 = vector.broadcast %22 : vector<1x1x1xi32> to vector<1x16x1xi32>
      %24 = arith.cmpi slt, %21, %23 : vector<1x16x1xi32>
      %c0_6 = arith.constant 0 : index
      %c0_7 = arith.constant 0 : index
      %c0_8 = arith.constant 0 : index
      %25 = vector.load %arg4[%c0_6, %c0_7, %c0_8] : memref<1x16x32xf32, #tpu.memory_space<vmem>>, vector<1x16x32xf32>
      %c0_i32_9 = arith.constant 0 : i32
      %26 = arith.sitofp %c0_i32_9 : i32 to f32
      %27 = vector.shape_cast %24 : vector<1x16x1xi1> to vector<1x16x1xi1>
      %28 = vector.broadcast %27 : vector<1x16x1xi1> to vector<1x16x32xi1>
      %29 = vector.broadcast %26 : f32 to vector<1x16x32xf32>
      %30 = arith.select %28, %25, %29 : vector<1x16x32xi1>, vector<1x16x32xf32>
      %31 = vector.shape_cast %30 : vector<1x16x32xf32> to vector<16x32xf32>
      %32 = arith.truncf %31 : vector<16x32xf32> to vector<16x32xbf16>
      %c0_10 = arith.constant 0 : index
      %c0_11 = arith.constant 0 : index
      %33 = vector.load %arg5[%c0_10, %c0_11] : memref<32x32xbf16, #tpu.memory_space<vmem>>, vector<32x32xbf16>
      %cst = arith.constant dense<0.000000e+00> : vector<16x32xf32>
      %34 = tpu.matmul %32, %33, %cst {dimension_numbers = #tpu.dot_dimension_numbers<[1], [0], [0], [1], [0, 0, 1, 1], [], []>} : vector<16x32xbf16>, vector<32x32xbf16>, vector<16x32xf32> -> vector<16x32xf32>
      %c0_12 = arith.constant 0 : index
      %c0_13 = arith.constant 0 : index
      %35 = vector.load %arg6[%c0_12, %c0_13] : memref<1x32xf32, #tpu.memory_space<vmem>>, vector<1x32xf32>
      %36 = vector.broadcast %35 : vector<1x32xf32> to vector<16x32xf32>
      %37 = arith.addf %34, %36 : vector<16x32xf32>
      %38 = math.tanh %37 : vector<16x32xf32>
      %c0_14 = arith.constant 0 : index
      %c0_15 = arith.constant 0 : index
      %39 = vector.load %arg7[%c0_14, %c0_15] : memref<1x32xf32, #tpu.memory_space<vmem>>, vector<1x32xf32>
      %40 = vector.broadcast %39 : vector<1x32xf32> to vector<16x32xf32>
      %41 = arith.mulf %38, %40 : vector<16x32xf32>
      %42 = vector.shape_cast %41 : vector<16x32xf32> to vector<1x16x32xf32>
      %cst_16 = arith.constant dense<0.000000e+00> : vector<1x16xf32>
      %43 = vector.multi_reduction <add>, %42, %cst_16 [2] : vector<1x16x32xf32> to vector<1x16xf32>
      %cst_17 = arith.constant -1.000000e+30 : f32
      %44 = vector.broadcast %cst_17 : f32 to vector<1x16xf32>
      %45 = arith.select %18, %43, %44 : vector<1x16xi1>, vector<1x16xf32>
      %c0_18 = arith.constant 0 : index
      %c0_19 = arith.constant 0 : index
      %46 = vector.load %arg9[%c0_18, %c0_19] : memref<1x1xf32, #tpu.memory_space<vmem>>, vector<1x1xf32>
      %cst_20 = arith.constant dense<0xFF800000> : vector<1xf32>
      %47 = vector.multi_reduction <maximumf>, %45, %cst_20 [1] : vector<1x16xf32> to vector<1xf32>
      %48 = vector.shape_cast %47 : vector<1xf32> to vector<1x1xf32>
      %49 = arith.maximumf %46, %48 : vector<1x1xf32>
      %50 = arith.subf %46, %49 : vector<1x1xf32>
      %51 = math.exp %50 : vector<1x1xf32>
      %52 = vector.broadcast %49 : vector<1x1xf32> to vector<1x16xf32>
      %53 = arith.subf %45, %52 : vector<1x16xf32>
      %54 = math.exp %53 : vector<1x16xf32>
      %cst_21 = arith.constant 0.000000e+00 : f32
      %55 = vector.broadcast %cst_21 : f32 to vector<1x16xf32>
      %56 = arith.select %18, %54, %55 : vector<1x16xi1>, vector<1x16xf32>
      %57 = vector.shape_cast %56 : vector<1x16xf32> to vector<1x16x1xf32>
      %58 = vector.broadcast %57 : vector<1x16x1xf32> to vector<1x16x32xf32>
      %59 = arith.mulf %30, %58 : vector<1x16x32xf32>
      %c0_22 = arith.constant 0 : index
      %c0_23 = arith.constant 0 : index
      %60 = vector.load %arg10[%c0_22, %c0_23] : memref<1x1xf32, #tpu.memory_space<vmem>>, vector<1x1xf32>
      %61 = arith.mulf %51, %60 : vector<1x1xf32>
      %cst_24 = arith.constant dense<0.000000e+00> : vector<1xf32>
      %62 = vector.multi_reduction <add>, %56, %cst_24 [1] : vector<1x16xf32> to vector<1xf32>
      %63 = vector.shape_cast %62 : vector<1xf32> to vector<1x1xf32>
      %64 = arith.addf %61, %63 : vector<1x1xf32>
      %c0_25 = arith.constant 0 : index
      %c0_26 = arith.constant 0 : index
      %65 = vector.load %arg10[%c0_25, %c0_26] : memref<1x1xf32, #tpu.memory_space<vmem>>, vector<1x1xf32>
      tpu.vector_store %arg10[%c0_25, %c0_26], %64 {strides = array<i32>} : memref<1x1xf32, #tpu.memory_space<vmem>>, vector<1x1xf32>,
      %c0_27 = arith.constant 0 : index
      %c0_28 = arith.constant 0 : index
      %66 = vector.load %arg11[%c0_27, %c0_28] : memref<1x32xf32, #tpu.memory_space<vmem>>, vector<1x32xf32>
      %67 = vector.broadcast %51 : vector<1x1xf32> to vector<1x32xf32>
      %68 = arith.mulf %67, %66 : vector<1x32xf32>
      %cst_29 = arith.constant dense<0.000000e+00> : vector<1x32xf32>
      %69 = vector.multi_reduction <add>, %59, %cst_29 [1] : vector<1x16x32xf32> to vector<1x32xf32>
      %70 = arith.addf %68, %69 : vector<1x32xf32>
      %c0_30 = arith.constant 0 : index
      %c0_31 = arith.constant 0 : index
      %71 = vector.load %arg11[%c0_30, %c0_31] : memref<1x32xf32, #tpu.memory_space<vmem>>, vector<1x32xf32>
      tpu.vector_store %arg11[%c0_30, %c0_31], %70 {strides = array<i32>} : memref<1x32xf32, #tpu.memory_space<vmem>>, vector<1x32xf32>,
      %c0_32 = arith.constant 0 : index
      %c0_33 = arith.constant 0 : index
      %72 = vector.load %arg12[%c0_32, %c0_33] : memref<1x32xf32, #tpu.memory_space<vmem>>, vector<1x32xf32>
      %73 = vector.broadcast %51 : vector<1x1xf32> to vector<1x32xf32>
      %74 = arith.mulf %73, %72 : vector<1x32xf32>
      %75 = arith.mulf %30, %59 : vector<1x16x32xf32>
      %cst_34 = arith.constant dense<0.000000e+00> : vector<1x32xf32>
      %76 = vector.multi_reduction <add>, %75, %cst_34 [1] : vector<1x16x32xf32> to vector<1x32xf32>
      %77 = arith.addf %74, %76 : vector<1x32xf32>
      %c0_35 = arith.constant 0 : index
      %c0_36 = arith.constant 0 : index
      %78 = vector.load %arg12[%c0_35, %c0_36] : memref<1x32xf32, #tpu.memory_space<vmem>>, vector<1x32xf32>
      tpu.vector_store %arg12[%c0_35, %c0_36], %77 {strides = array<i32>} : memref<1x32xf32, #tpu.memory_space<vmem>>, vector<1x32xf32>,
      %c0_37 = arith.constant 0 : index
      %c0_38 = arith.constant 0 : index
      %79 = vector.load %arg9[%c0_37, %c0_38] : memref<1x1xf32, #tpu.memory_space<vmem>>, vector<1x1xf32>
      tpu.vector_store %arg9[%c0_37, %c0_38], %49 {strides = array<i32>} : memref<1x1xf32, #tpu.memory_space<vmem>>, vector<1x1xf32>,
    } else {
    }
    %c0_i32_2 = arith.constant 0 : i32
    %8 = arith.cmpi eq, %arg1, %c0_i32_2 : i32
    %9 = arith.extui %8 : i1 to i32
    %c0_i32_3 = arith.constant 0 : i32
    %10 = arith.cmpi ne, %9, %c0_i32_3 : i32
    scf.if %10 {
      %c0 = arith.constant 0 : index
      %c0_4 = arith.constant 0 : index
      %11 = vector.load %arg10[%c0, %c0_4] : memref<1x1xf32, #tpu.memory_space<vmem>>, vector<1x1xf32>
      %cst = arith.constant 1.000000e-30 : f32
      %12 = vector.broadcast %cst : f32 to vector<1x1xf32>
      %13 = arith.maximumf %11, %12 : vector<1x1xf32>
      %14 = tpu.reciprocal %13 : vector<1x1xf32> -> vector<1x1xf32>
      %c0_5 = arith.constant 0 : index
      %c0_6 = arith.constant 0 : index
      %15 = vector.load %arg11[%c0_5, %c0_6] : memref<1x32xf32, #tpu.memory_space<vmem>>, vector<1x32xf32>
      %16 = vector.broadcast %14 : vector<1x1xf32> to vector<1x32xf32>
      %17 = arith.mulf %15, %16 : vector<1x32xf32>
      %c0_7 = arith.constant 0 : index
      %c0_8 = arith.constant 0 : index
      %18 = vector.load %arg12[%c0_7, %c0_8] : memref<1x32xf32, #tpu.memory_space<vmem>>, vector<1x32xf32>
      %19 = vector.broadcast %14 : vector<1x1xf32> to vector<1x32xf32>
      %20 = arith.mulf %18, %19 : vector<1x32xf32>
      %21 = arith.mulf %17, %17 : vector<1x32xf32>
      %22 = arith.subf %20, %21 : vector<1x32xf32>
      %cst_9 = arith.constant 9.99999974E-6 : f32
      %23 = vector.broadcast %cst_9 : f32 to vector<1x32xf32>
      %24 = arith.maximumf %22, %23 : vector<1x32xf32>
      %25 = math.sqrt %24 : vector<1x32xf32>
      %c0_10 = arith.constant 0 : index
      %c0_11 = arith.constant 0 : index
      %c0_12 = arith.constant 0 : index
      %26 = vector.load %arg8[%c0_10, %c0_11, %c0_12] : memref<1x2x32xf32, #tpu.memory_space<vmem>>, vector<1x1x32xf32>
      %27 = vector.shape_cast %26 : vector<1x1x32xf32> to vector<1x32xf32>
      %28 = vector.shape_cast %17 : vector<1x32xf32> to vector<1x1x32xf32>
      tpu.vector_store %arg8[%c0_10, %c0_11, %c0_12], %28 {strides = array<i32>} : memref<1x2x32xf32, #tpu.memory_space<vmem>>, vector<1x1x32xf32>,
      %c0_13 = arith.constant 0 : index
      %c1 = arith.constant 1 : index
      %c0_14 = arith.constant 0 : index
      %29 = vector.load %arg8[%c0_13, %c1, %c0_14] : memref<1x2x32xf32, #tpu.memory_space<vmem>>, vector<1x1x32xf32>
      %30 = vector.shape_cast %29 : vector<1x1x32xf32> to vector<1x32xf32>
      %31 = vector.shape_cast %25 : vector<1x32xf32> to vector<1x1x32xf32>
      tpu.vector_store %arg8[%c0_13, %c1, %c0_14], %31 {strides = array<i32>} : memref<1x2x32xf32, #tpu.memory_space<vmem>>, vector<1x1x32xf32>,
    } else {
    }
    return
  }
  func.func @transform_0(%arg0: i32, %arg1: i32, %arg2: memref<2xi32, #tpu.memory_space<smem>>) -> (i32, i32, i32) {
    %c0_i32 = arith.constant 0 : i32
    %c0_i32_0 = arith.constant 0 : i32
    %c0_i32_1 = arith.constant 0 : i32
    return %arg0, %c0_i32, %c0_i32_0 : i32, i32, i32
  }
  func.func @transform_1(%arg0: i32, %arg1: i32, %arg2: memref<2xi32, #tpu.memory_space<smem>>) -> (i32, i32, i32) {
    %0 = arith.index_cast %arg0 : i32 to index
    %1 = memref.load %arg2[%0] : memref<2xi32, #tpu.memory_space<smem>>
    %c1_i32 = arith.constant 1 : i32
    %2 = arith.subi %1, %c1_i32 : i32
    %3 = arith.minsi %arg1, %2 : i32
    %c0_i32 = arith.constant 0 : i32
    %c0_i32_0 = arith.constant 0 : i32
    return %arg0, %3, %c0_i32 : i32, i32, i32
  }
  func.func @transform_2(%arg0: i32, %arg1: i32, %arg2: memref<2xi32, #tpu.memory_space<smem>>) -> (i32, i32) {
    %c0_i32 = arith.constant 0 : i32
    %c0_i32_0 = arith.constant 0 : i32
    %c0_i32_1 = arith.constant 0 : i32
    return %c0_i32, %c0_i32_0 : i32, i32
  }
  func.func @transform_3(%arg0: i32, %arg1: i32, %arg2: memref<2xi32, #tpu.memory_space<smem>>) -> (i32, i32) {
    %c0_i32 = arith.constant 0 : i32
    %c0_i32_0 = arith.constant 0 : i32
    %c0_i32_1 = arith.constant 0 : i32
    return %c0_i32, %c0_i32_0 : i32, i32
  }
  func.func @transform_4(%arg0: i32, %arg1: i32, %arg2: memref<2xi32, #tpu.memory_space<smem>>) -> (i32, i32) {
    %c0_i32 = arith.constant 0 : i32
    %c0_i32_0 = arith.constant 0 : i32
    %c0_i32_1 = arith.constant 0 : i32
    return %c0_i32, %c0_i32_0 : i32, i32
  }
  func.func @transform_5(%arg0: i32, %arg1: i32, %arg2: memref<2xi32, #tpu.memory_space<smem>>) -> (i32, i32, i32) {
    %c0_i32 = arith.constant 0 : i32
    %c0_i32_0 = arith.constant 0 : i32
    %c0_i32_1 = arith.constant 0 : i32
    return %arg0, %c0_i32, %c0_i32_0 : i32, i32, i32
  }
}

</mosaic_0001>

<bundles_post_ra>
// kernel: attentive_stats_pooling.1
= control target key start
LH: loop header
LB: loop body
LE: loop exit
PB: predicated region body
PF: predicated region fallthrough
CT: control target
= control target key end

     0   :  { %s912_s0 = inlined_call_operand.vmem [shape: s32[2], index: 0, kind: input, shape index: {}]   ;;  %s913_s1 = inlined_call_operand.vmem [shape: s32[2,1,1], index: 1, kind: input, shape index: {}]   ;;  %s914_s2 = inlined_call_operand.vmem [shape: f32[2,16,32], index: 2, kind: input, shape index: {}]   ;;  %s915_s3 = inlined_call_operand.vmem [shape: bf16[32,32], index: 3, kind: input, shape index: {}]   ;;  %s916_s4 = inlined_call_operand.vmem [shape: f32[1,32], index: 4, kind: input, shape index: {}]   ;;  %s917_s5 = inlined_call_operand.vmem [shape: f32[1,32], index: 5, kind: input, shape index: {}]   ;;  %s918_s6 = inlined_call_operand.vmem [shape: f32[2,2,32], index: 6, kind: output, shape index: {}]  }
   0x1   :  { %s11_s23 = sshll.u32 %s912_s0, 4  ;;  %s12_s23 = int_to_ptr.vmem [resolvable:$true] %s11_s23 }
   0x2   :  { %s729_s24 = scalar_lea.vmem %s12_s23, 16  ;;  %p734_p1 = scmp.lt.s32.totalorder %s12_s23, %s12_s23 }
   0x3   :  { %p730_p0 = scmp.ne.s32.totalorder %s12_s23, %s729_s24  ;;  %p735_p2 = scmp.lt.s32.totalorder %s729_s24, %s729_s24 }
   0x5   :  { %p736_p3 = por %p735_p2, %p734_p1 }
   0x7   :  { %p737_p4 = pnand %p736_p3, %p730_p0 }
   0x9   :  { %740 = shalt.err (!%p737_p4)  }
   0xa   :  { %s767_s25 = smov [#allocation7]  }
   0xb   :  { %14 = dma.vmem_to_smem %s12_s23, 16, %s767_s25, [#allocation6] }
   0xc   :  { %753 = dma.done.wait [#allocation6], 16 }
   0xd   :  { %754 = vsyncadd [#allocation6], 4294967280 }
   0xe   :  { %16 = sfence }
   0xf   :  { %s812_s26 = smov 0   ;;  %s814_s27 = smov 0  }
  0x10   :  { %s816_s28 = smov 0  }
  0x11 LB: > { %s34_s0 = sadd.s32 1, %s761_s27  ;;  %p654_p5 = scmp.ge.s32.totalorder %s765_s28, 1  ;;  %s765_s28 = sphi %s816_s28, %s22_s28   ;;  %s761_s27 = sphi %s814_s27, %s922_s27   ;;  %s757_s26 = sphi %s812_s26, %s921_s26  }
  0x12   : > { %p36_p6 = scmp.ge.s32.totalorder %s34_s0, 2  ;;  %p237_p7 = scmp.lt.s32.totalorder %s765_s28, 3 }
  0x14   : > { %s924_s0 = smov (%p36_p6, %s34_s0), 0  ;;  %p238_p8 = pnand %p654_p5, %p237_p7 }
  0x15   : > { %p275_p9 = scmp.lt.s32.totalorder (!%p238_p8), %s757_s26, 1  ;;  %s278_s29 = sld [smem:[#allocation7 + %s757_s26]] (!%p238_p8)  ;;  %vm305_vm0 = vcmask (!%p238_p8), 0   ;;  %v768_v0 = vmov (!%p238_p8), -1e+30   ;;  %v769_v1 = vmov (!%p238_p8), 0.0  }
  0x16   : > { %241 = sbr.rel (%p238_p8) target bundleno = 1197 (0x4ad), region = 40  ;;  %306 = vst.msk [vmem:[#allocation2] sm:$0x1] (!%p238_p8), %vm305_vm0, %v768_v0  ;;  %307 = vst.msk [vmem:[#allocation3] sm:$0x1] (!%p238_p8), %vm305_vm0, %v769_v1  ;;  %vm308_vm1 = vcmask (!%p238_p8), 253952  }
  0x17   : > { %s311_s30 = sld [smem:[#allocation7 + %s757_s26]] (!%p238_p8)  ;;  %309 = vst.msk [vmem:[#allocation4] sm:$0x1] (!%p238_p8), %vm308_vm1, %v769_v1  ;;  %310 = vst.msk [vmem:[#allocation5] sm:$0x1] (!%p238_p8), %vm308_vm1, %v769_v1 }
  0x1b   : > { %s655_s14 = sadd.s32 (!%p238_p8), 4294967295, %s278_s29 }
  0x1c   : > { %p656_p10 = scmp.gt.s32.totalorder (!%p238_p8), %s655_s14, 0 }
  0x1d   : > { %s926_s26 = smov (!%p275_p9, %s757_s26), 1  ;;  %p662_p12 = scmp.le.s32.totalorder %s311_s30, 0 }
  0x1e   : > { %s277_s9 = scalar_lea.vmem %s913_s1, %s926_s26  ;;  %s658_s10 = sshll.u32 %s926_s26, 1  ;;  %v318_v2 = vlaneseq (!%p662_p12)  ;;  %v770_v3 = vmov (!%p662_p12), 0   ;;  %v714_v10 = vld [vmem:[%s915_s3] sm:$0xff] (!%p662_p12)   ;;  %v771_v11 = vmov (!%p662_p12), 0.0   ;;  %v715_v13 = vld [vmem:[%s915_s3 + $0x8] sm:$0xff] (!%p662_p12)   ;;  %vm772_vm4 = vmmov (!%p662_p12), 0  }
  0x1f   : > { %s840_s13 = scalar_lea.vmem %s918_s6, %s658_s10  ;;  %s928_s14 = smov (%p656_p10, %s655_s14), 0  ;;  %712 = vset.pattern.permute.xlu0 (!%p662_p12), %v770_v3  ;;  %713 = vset.pattern.permute.xlu1 (!%p662_p12), %v770_v3  ;;  %v316_v5 = vld [vmem:[%s277_s9] sm:$0x1] (!%p662_p12)  ;;  %vm379_vm7 = vcmask (!%p662_p12), 261120   ;;  %vm452_vm8 = vcmask (!%p662_p12), 130112   ;;  %vm457_vm9 = vcmask (!%p662_p12), 122880  }
  0x20   : > { %s657_s15 = sshll.u32 %s928_s14, 1  ;;  %315 = sbr.rel (%p662_p12) target bundleno = 1023 (0x3ff), region = 48  ;;  %v326_v4 = vshrl.u32 (!%p662_p12), %v318_v2, 7  ;;  %673 = vmatprep.subr.bf16.mxu0 (!%p662_p12), %v771_v11  ;;  %677 = vmatprep.mubr.msk.bf16.mxu0 (!%p662_p12), %vm772_vm4, %v771_v11  ;;  %v663_v21 = vld [vmem:[%s916_s4] ss:$0 sm:$0xff] (!%p662_p12)  ;;  %v319_v35 = vand.u32 (!%p662_p12), 127, %v318_v2 }
  0x21   : > { %p285_p11 = scmp.lt.s32.totalorder %s657_s15, 1  ;;  %674 = vmatpush3.bf16.msra.mxu0 (!%p662_p12), %v714_v10  ;;  %v667_v28 = vld [vmem:[%s917_s5] ss:$0 sm:$0xff] (!%p662_p12) }
  0x22   : > { %v847_v6 = vsub.s32 (!%p662_p12), 0, %v326_v4  ;;  %v332_v7 = vadd.s32 (!%p662_p12), 8, %v326_v4  ;;  %675 = vmatprep.subr.bf16.mxu0 (!%p662_p12), %v771_v11  ;;  %v447_v36 = vadd.s32 (!%p662_p12), 4294967288, %v319_v35  ;;  %v445_v39 = vsub.s32 (!%p662_p12), %v319_v35, %v326_v4  ;;  %v456_v49 = vld [vmem:[#allocation2] sm:$0x1] (!%p662_p12) }
  0x23   : > { %s930_s15 = smov (!%p285_p11, %s657_s15), 1 }
  0x24   : > { %s288_s16 = sadd.s32 %s658_s10, %s930_s15  ;;  %v338_v8 = vrot.slane (!%p662_p12), %v316_v5, %v847_v6  ;;  %v450_v40 = vsub.s32 (!%p662_p12), %v447_v36, %v326_v4 }
  0x25   : > { %s659_s17 = sshll.u32 %s288_s16, 3  ;;  %676 = vmatpush3.bf16.msra.mxu0 (!%p662_p12), %v715_v13 }
  0x26   : > { %s845_s20 = scalar_lea.vmem %s914_s2, %s659_s17  ;;  %vm339_vm2 = vcmp.lt.s32.totalorder (!%p662_p12), %v326_v4, %v338_v8  ;;  %vm340_vm3 = vcmp.lt.s32.totalorder (!%p662_p12), %v332_v7, %v338_v8 }
  0x27   : > { %v343_v9 = vsel %vm339_vm2, 1, %v770_v3  ;;  %v344_v12 = vsel %vm340_vm3, 1, %v770_v3  ;;  %v341_v15 = vld [vmem:[%s845_s20] sm:$0xff]  ;;  %v342_v16 = vld [vmem:[%s845_s20 + $0x8] sm:$0xff] }
  0x28   : > { %346 = vperm.xlu0 %712, %v343_v9  }
  0x2c   : > { %349 = vperm.xlu0 %712, %v344_v12  }
  0x30   : > { %323 = vperm.xlu0 %712, %v316_v5  }
  0xa7   : > { %v347_v14 = vpop.permute.xlu0 %346 }
  0xa8   : > { %vm351_vm5 = vcmp.eq.s32.totalorder %v347_v14, 1 }
  0xa9   : > { %v858_v18 = vsel %vm351_vm5, %v341_v15, 0.0 }
  0xab   : > { %v350_v17 = vpop.permute.xlu0 %349 }
  0xac   : > { %vm352_vm6 = vcmp.eq.s32.totalorder %v350_v17, 1 }
  0xad   : > { %v860_v19 = vsel %vm352_vm6, %v342_v16, 0.0 }
  0xae   : > { %v355_v20 = vpack.c.bf16 %v860_v19, %v858_v18 }
  0xaf   : > { %v324_v37 = vpop.permute.xlu0 %323 }
  0xb0   : > { %678 = vmatmul.mubr.msk.bf16.vlgmr.msra.gmra.mrb[0].mxu0 %vm379_vm7, %v355_v20  ;;  %v328_v41 = vrot.slane %v324_v37, %v847_v6 }
  0xb2   : > { %vm874_vm10 = vcmp.lt.s32.totalorder %v319_v35, %v328_v41 }
 0x183   : > { %v417_v22 = vpop.f32.mrb[0].mxu0 }
 0x184   : > { %v418_v23 = vadd.f32 %v663_v21, %v417_v22  ;;  %v679_v24 = vpop.f32.mrb[1].mxu0 }
 0x185   : > { %v420_v25 = vpop.f32.mrb[2].mxu0  ;;  %v522_v24 = vld [vmem:[#allocation5] sm:$0x1] }
 0x186   : > { %716 = vtanh.f32 %v418_v23  ;;  %v421_v26 = vadd.f32 %v663_v21, %v420_v25  ;;  %v680_v27 = vpop.f32.mrb[3].mxu0  ;;  %v499_v23 = vld [vmem:[#allocation4] sm:$0x1] }
 0x188   : > { %718 = vtanh.f32 %v421_v26 }
 0x190   : > { %v717_v29 = vpop.eup %716 }
 0x191   : > { %v433_v30 = vmul.f32 %v717_v29, %v667_v28 }
 0x192   : > { %v719_v31 = vpop.eup %718 }
 0x193   : > { %v435_v32 = vsel %vm379_vm7, %v433_v30, 0.0  ;;  %v434_v33 = vmul.f32 %v719_v31, %v667_v28 }
 0x194   : > { %436 = vadd.xlane.f32.xlu1 %v435_v32  ;;  %v491_v32 = vld [vmem:[#allocation3] sm:$0x1] }
 0x195   : > { %v438_v34 = vsel %vm379_vm7, %v434_v33, 0.0 }
 0x198   : > { %439 = vadd.xlane.f32.xlu1 %v438_v34 }
 0x221   : > { %v437_v38 = vpop.xlane.xlu1 %436 }
 0x222   : > { %v446_v43 = vrot.slane %v437_v38, %v445_v39 }
 0x225   : > { %v440_v42 = vpop.xlane.xlu1 %439 }
 0x226   : > { %v451_v44 = vrot.slane %v440_v42, %v450_v40 }
 0x228   : > { %v453_v46 = vsel %vm452_vm8, %v451_v44, %v446_v43 }
 0x229   : > { %v455_v47 = vsel %vm874_vm10, %v453_v46, -1e+30 }
 0x22a   : > { %v458_v48 = vsel %vm457_vm9, %v455_v47, -inf }
 0x22b   : > { %459 = vmax.xlane.f32.xlu1 %v458_v48 }
 0x2b8   : > { %v460_v50 = vpop.xlane.xlu1 %459 }
 0x2b9   : > { %v461_v51 = vmax.f32 %v456_v49, %v460_v50 }
 0x2bb   : > { %v462_v52 = vsub.f32 %v456_v49, %v461_v51  ;;  %537 = vst.msk [vmem:[#allocation2] sm:$0x1] %vm305_vm0, %v461_v51  ;;  %467 = vperm.xlu0 %712, %v461_v51  }
 0x2bd   : > { %v463_v57 = vmul.f32 1.442695, %v462_v52 }
 0x33a   : > { %v468_v53 = vpop.permute.xlu0 %467 }
 0x33b   : > { %v473_v54 = vrot.slane %v468_v53, %v847_v6 }
 0x33d   : > { %v474_v55 = vsub.f32 %v455_v47, %v473_v54 }
 0x33f   : > { %v475_v56 = vmul.f32 1.442695, %v474_v55 }
 0x341   : > { %720 = vpow2.f32 %v475_v56 }
 0x342   : > { %722 = vpow2.f32 %v463_v57 }
 0x34b   : > { %v721_v58 = vpop.eup %720 }
 0x34c   : > { %v477_v59 = vsel %vm874_vm10, %v721_v58, 0.0  ;;  %v723_v61 = vpop.eup %722 }
 0x34d   : > { %v481_v60 = vrot.slane %v477_v59, %v847_v6  ;;  %v493_v62 = vsel %vm457_vm9, %v477_v59, 0.0  ;;  %v492_v33 = vmul.f32 %v723_v61, %v491_v32 }
 0x34f   : > { %487 = vbcast.lane.b32.xlu0 %v481_v60, 264  ;;  %483 = vbcast.lane.b32.xlu1 %v481_v60, 256 }
 0x353   : > { %502 = vperm.xlu1 %713, %v723_v61  }
 0x36e   : > { %494 = vadd.xlane.f32.xlu0 %v493_v62 }
 0x3c1   : > { %v488_v63 = vpop.permute.xlu0 %487  ;;  %v484_v0 = vpop.permute.xlu1 %483 }
 0x3c2   : > { %v490_v1 = vmul.f32 %v488_v63, %v860_v19  ;;  %v489_v2 = vmul.f32 %v484_v0, %v858_v18 }
 0x3c4   : > { %v511_v3 = vsel %vm379_vm7, %v490_v1, 0.0  ;;  %v525_v4 = vmul.f32 %v490_v1, %v860_v19  ;;  %v510_v5 = vsel %vm379_vm7, %v489_v2, 0.0  ;;  %v524_v7 = vmul.f32 %v489_v2, %v858_v18 }
 0x3c5   : > { %v512_v8 = vadd.f32 %v511_v3, %v510_v5 }
 0x3c6   : > { %v527_v9 = vsel %vm379_vm7, %v525_v4, 0.0  ;;  %v526_v10 = vsel %vm379_vm7, %v524_v7, 0.0 }
 0x3c7   : > { %v513_v11 = vrot.slane %v512_v8, 4  ;;  %v528_v12 = vadd.f32 %v527_v9, %v526_v10 }
 0x3c9   : > { %v514_v13 = vadd.f32 %v513_v11, %v512_v8  ;;  %v529_v14 = vrot.slane %v528_v12, 4 }
 0x3cb   : > { %v515_v15 = vrot.slane %v514_v13, 2  ;;  %v530_v16 = vadd.f32 %v529_v14, %v528_v12 }
 0x3cd   : > { %v516_v17 = vadd.f32 %v515_v15, %v514_v13  ;;  %v531_v20 = vrot.slane %v530_v16, 2 }
 0x3cf   : > { %v532_v21 = vadd.f32 %v531_v20, %v530_v16  ;;  %v517_v22 = vrot.slane %v516_v17, 1 }
 0x3d1   : > { %v533_v19 = vrot.slane %v532_v21, 1  ;;  %v518_v26 = vadd.f32 %v517_v22, %v516_v17 }
 0x3d2   : > { %v503_v25 = vpop.permute.xlu1 %502 }
 0x3d3   : > { %v508_v18 = vrot.slane %v503_v25, %v847_v6  ;;  %v534_v27 = vadd.f32 %v533_v19, %v532_v21 }
 0x3d5   : > { %v509_v28 = vmul.f32 %v508_v18, %v499_v23  ;;  %v523_v29 = vmul.f32 %v522_v24, %v508_v18 }
 0x3d7   : > { %v519_v30 = vadd.f32 %v518_v26, %v509_v28  ;;  %v535_v31 = vadd.f32 %v534_v27, %v523_v29 }
 0x3d9   : > { %521 = vst.msk [vmem:[#allocation4] sm:$0x1] %vm308_vm1, %v519_v30  ;;  %536 = vst.msk [vmem:[#allocation5] sm:$0x1] %vm308_vm1, %v535_v31 }
 0x3fb   : > { %v495_v34 = vpop.xlane.xlu0 %494 }
 0x3fc   : > { %v496_v35 = vadd.f32 %v495_v34, %v492_v33 }
 0x3fe   : > { %498 = vst.msk [vmem:[#allocation3] sm:$0x1] %vm305_vm0, %v496_v35 }
 0x3ff PF: > { %v773_v37 = vmov 0   ;;  %v550_v39 = vlaneseq  ;;  %v544_v42 = vld [vmem:[#allocation4] sm:$0x1]  ;;  %v555_v45 = vld [vmem:[#allocation5] sm:$0x1] }
 0x400   : > { %724 = vset.pattern.permute.xlu0 %v773_v37 }
 0x401   : > { %v551_v40 = vshrl.u32 %v550_v39, 7 }
 0x403   : > { %v552_v41 = vsub.s32 0, %v551_v40 }
 0x405   : > { %v541_v36 = vld [vmem:[#allocation3] sm:$0x1] }
 0x406   : > { %v542_v6 = vmax.f32 %v541_v36, 1e-30 }
 0x408   : > { %725 = vrcp.f32 %v542_v6 }
 0x412   : > { %v726_v38 = vpop.eup %725 }
 0x413   : > { %547 = vperm.xlu0 %724, %v726_v38  }
 0x492   : > { %v548_v43 = vpop.permute.xlu0 %547 }
 0x493   : > { %v553_v44 = vrot.slane %v548_v43, %v552_v41 }
 0x495   : > { %v554_v46 = vmul.f32 %v553_v44, %v544_v42  ;;  %v556_v47 = vmul.f32 %v555_v45, %v553_v44 }
 0x497   : > { %v557_v48 = vmul.f32 %v554_v46, %v554_v46  ;;  %568 = vst.msk [vmem:[%s840_s13] sm:$0x1] %vm308_vm1, %v554_v46 }
 0x499   : > { %v558_v49 = vsub.f32 %v556_v47, %v557_v48 }
 0x49b   : > { %v559_v50 = vmax.f32 %v558_v49, 1e-05 }
 0x49d   : > { %727 = vrsqrt.f32 %v559_v50  ;;  %vm562_vm11 = vcmp.eq.f32.partialorder %v559_v50, inf  ;;  %v565_v53 = vand.u32 2147483648, %v559_v50  ;;  %vm564_vm12 = vcmp.eq.f32.partialorder %v559_v50, 0.0 }
 0x4a7   : > { %v728_v51 = vpop.eup %727 }
 0x4a8   : > { %v561_v52 = vmul.f32 %v728_v51, %v559_v50 }
 0x4aa   : > { %v563_v54 = vsel %vm562_vm11, %v559_v50, %v561_v52 }
 0x4ab   : > { %v566_v55 = vsel %vm564_vm12, %v565_v53, %v563_v54 }
 0x4ac   : > { %569 = vst.msk [vmem:[%s840_s13 + $0x1] sm:$0x1] %vm308_vm1, %v566_v55 }
 0x4ad PF: > { %s22_s28 = sadd.s32 1, %s765_s28   ;;  %s921_s26 = smov %s761_s27 }
 0x4ae   : > { %p19_p13 = scmp.ge.s32.totalorder %s22_s28, 4   ;;  %s922_s27 = smov %s924_s0 }
 0x4b0   :  { %21 = sbr.rel (!%p19_p13) target bundleno = 17 (0x11), region = 85 }

</bundles_post_ra>
